<compile_context>
chip_gen: v7x
topology: tpu7x:2x2x1
jax: 0.10.0
libtpu: 0.0.40
codegen_flags: <defaults>
</compile_context>

<pallas_src>
import functools
import math

import jax
import jax.numpy as jnp
from jax.experimental import pallas as pl
from jax.experimental.pallas import tpu as pltpu


def _round_up(x, m):
    return ((x + m - 1) // m) * m


# ---------------------------------------------------------------------------
# Fused Pallas kernel: out = (Ry @ m @ Rx) > logit_thr  (uint8 out)
# ---------------------------------------------------------------------------
def _segm_kernel(pred_ref, ry_ref, rx_ref, out_ref, t_ref, *, logit_thr):
    tq, ohp, _ = t_ref.shape
    w, owp = rx_ref.shape
    ry = ry_ref[...]                                   # (OHP, H), hoisted load
    # Row stage: per-query MXU matmul into VMEM scratch.
    for q in range(tq):                                # static unroll, tq small
        t_ref[q] = jnp.dot(ry, pred_ref[q].astype(jnp.float32),
                           preferred_element_type=jnp.float32)
    # Column stage: one matmul fused across all TQ queries in the block.
    t = t_ref[...].reshape(tq * ohp, w)                # layout-free (OHP % 8 == 0)
    o = jnp.dot(t, rx_ref[...], preferred_element_type=jnp.float32)
    o = o.reshape(tq, ohp, owp)
    # sigmoid(o) > threshold  <=>  o > logit(threshold); emit uint8 directly.
    out_ref[...] = (o > logit_thr).astype(jnp.uint8)


# ---------------------------------------------------------------------------
# Host-side interpolation / selection matrix builders (static shapes)
# ---------------------------------------------------------------------------
def _bilinear_matrix(in_size, out_size):
    """(out_size, in_size) matrix for F.interpolate(mode='bilinear',
    align_corners=False) along one axis."""
    scale = in_size / out_size
    j = jnp.arange(out_size, dtype=jnp.float32)
    src = jnp.maximum((j + 0.5) * scale - 0.5, 0.0)
    i0 = jnp.minimum(jnp.floor(src).astype(jnp.int32), in_size - 1)
    i1 = jnp.minimum(i0 + 1, in_size - 1)
    lam = src - i0.astype(jnp.float32)
    w0 = 1.0 - lam
    return (w0[:, None] * jax.nn.one_hot(i0, in_size, dtype=jnp.float32)
            + lam[:, None] * jax.nn.one_hot(i1, in_size, dtype=jnp.float32))


def _nearest_matrix(full_size, out_size, crop_size):
    """(out_size, full_size) 0/1 matrix: crop the axis to `crop_size` then
    F.interpolate(mode='nearest') to `out_size`."""
    scale = crop_size / out_size
    j = jnp.arange(out_size, dtype=jnp.float32)
    src = jnp.minimum(jnp.floor(j * scale).astype(jnp.int32), crop_size - 1)
    return jax.nn.one_hot(src, full_size, dtype=jnp.float32)


def _choose_tq(q, h, w, ohp, owp, budget=20 * 1024 * 1024):
    """Largest divisor of q (<= 8) whose estimated VMEM footprint fits budget."""
    fixed = 2 * 4 * (ohp * h + w * owp)                       # Ry/Rx double-buffered
    per_q = 2 * 4 * h * w + 4 * ohp * w + 2 * ohp * owp       # pred, scratch, out
    best = 1
    for tq in range(1, min(q, 8) + 1):
        if q % tq == 0 and fixed + tq * per_q <= budget:
            best = tq
    return best


# ---------------------------------------------------------------------------
# Module-equivalent wrapper
# ---------------------------------------------------------------------------
def post_process_segm(results, outputs, orig_target_sizes, max_target_sizes,
                      threshold=0.5):
    assert len(orig_target_sizes) == len(max_target_sizes)
    # Host-side size extraction, mirroring .tolist() in the PyTorch module
    # (per-image output shapes must be static at trace time).
    msz = [(int(t[0]), int(t[1])) for t in list(max_target_sizes)]
    osz = [(int(t[0]), int(t[1])) for t in list(orig_target_sizes)]
    max_h = max(h for h, _ in msz)
    max_w = max(w for _, w in msz)

    pred = jnp.squeeze(outputs['pred_masks'], axis=2)          # (B, Q, H, W)
    B, Q, H, W = pred.shape

    # sigmoid(x) > t  <=>  x > logit(t); guard extreme thresholds.
    if threshold <= 0.0:
        logit_thr = -float('inf')
    elif threshold >= 1.0:
        logit_thr = float('inf')
    else:
        logit_thr = float(math.log(threshold) - math.log1p(-threshold))

    # Batch-max padded output extents (lane-dense last dim; uint8-tile-friendly
    # second-to-last dim). Padding is sliced off per image below.
    OHP = _round_up(max(h for h, _ in osz), 32)
    OWP = _round_up(max(w for _, w in osz), 128)

    # Shared bilinear-resize matrices.
    rh = _bilinear_matrix(H, max_h)                            # (max_h, H)
    rw = _bilinear_matrix(W, max_w)                            # (max_w, W)

    # Per-image folded matrices: Ry = Sy @ Rh, Rx = (Sx @ Rw)^T.  Exact fold:
    # Sy/Sx are 0/1 single-selection matrices, so thresholding commutes.
    ry_list, rx_list = [], []
    for i in range(B):
        img_h, img_w = msz[i]
        orig_h, orig_w = osz[i]
        sy = _nearest_matrix(max_h, orig_h, img_h)             # (orig_h, max_h)
        sx = _nearest_matrix(max_w, orig_w, img_w)             # (orig_w, max_w)
        ry_i = sy @ rh                                         # (orig_h, H)
        rx_i = (sx @ rw).T                                     # (W, orig_w)
        ry_list.append(jnp.pad(ry_i, ((0, OHP - orig_h), (0, 0))))
        rx_list.append(jnp.pad(rx_i, ((0, 0), (0, OWP - orig_w))))
    ry = jnp.stack(ry_list)                                    # (B, OHP, H)
    rx = jnp.stack(rx_list)                                    # (B, W, OWP)

    TQ = _choose_tq(Q, H, W, OHP, OWP)

    flops = 2 * B * Q * (OHP * H * W + OHP * W * OWP)
    bytes_accessed = (4 * (B * Q * H * W + B * OHP * H + B * W * OWP)
                      + B * Q * OHP * OWP)

    out = pl.pallas_call(
        functools.partial(_segm_kernel, logit_thr=logit_thr),
        out_shape=jax.ShapeDtypeStruct((B, Q, OHP, OWP), jnp.uint8),
        grid=(B, Q // TQ),
        in_specs=[
            pl.BlockSpec((None, TQ, H, W), lambda b, q: (b, q, 0, 0)),
            pl.BlockSpec((None, OHP, H), lambda b, q: (b, 0, 0)),
            pl.BlockSpec((None, W, OWP), lambda b, q: (b, 0, 0)),
        ],
        out_specs=pl.BlockSpec((None, TQ, OHP, OWP), lambda b, q: (b, q, 0, 0)),
        scratch_shapes=[pltpu.VMEM((TQ, OHP, W), jnp.float32)],
        compiler_params=pltpu.CompilerParams(
            dimension_semantics=("parallel", "parallel")),
        cost_estimate=pl.CostEstimate(flops=flops, transcendentals=0,
                                      bytes_accessed=bytes_accessed),
    )(pred, ry, rx)                                            # (B, Q, OHP, OWP) u8

    for i in range(B):
        orig_h, orig_w = osz[i]
        results[i]['masks'] = out[i, :, :orig_h, :orig_w][:, None, :, :]
    return results


class PostProcessSegm:
    """JAX/Pallas port of DETR's PostProcessSegm (eval-only)."""

    def __init__(self, threshold=0.5):
        self.threshold = threshold

    def __call__(self, results, outputs, orig_target_sizes, max_target_sizes):
        return post_process_segm(results, outputs, orig_target_sizes,
                                 max_target_sizes, threshold=self.threshold)


# ---------------------------------------------------------------------------
# Pure-JAX gather-based reference (no Pallas, no matrix formulation)
# ---------------------------------------------------------------------------
def _ref_bilinear(x, out_h, out_w):
    hh, ww = x.shape[-2], x.shape[-1]

    def coords(in_size, out_size):
        j = jnp.arange(out_size, dtype=jnp.float32)
        src = jnp.maximum((j + 0.5) * (in_size / out_size) - 0.5, 0.0)
        i0 = jnp.minimum(jnp.floor(src).astype(jnp.int32), in_size - 1)
        i1 = jnp.minimum(i0 + 1, in_size - 1)
        lam = src - i0.astype(jnp.float32)
        return i0, i1, lam

    y0, y1, ly = coords(hh, out_h)
    x0, x1, lx = coords(ww, out_w)
    rows0 = x[:, y0, :]
    rows1 = x[:, y1, :]
    top = rows0[:, :, x0] * (1.0 - lx) + rows0[:, :, x1] * lx
    bot = rows1[:, :, x0] * (1.0 - lx) + rows1[:, :, x1] * lx
    ly = ly[None, :, None]
    return top * (1.0 - ly) + bot * ly


def _ref_nearest(x, out_h, out_w):
    hh, ww = x.shape[-2], x.shape[-1]
    sy = jnp.minimum(jnp.floor(jnp.arange(out_h, dtype=jnp.float32)
                               * (hh / out_h)).astype(jnp.int32), hh - 1)
    sx = jnp.minimum(jnp.floor(jnp.arange(out_w, dtype=jnp.float32)
                               * (ww / out_w)).astype(jnp.int32), ww - 1)
    return x[:, sy, :][:, :, sx]


def _ref_post_process(pred_masks, orig_target_sizes, max_target_sizes, threshold):
    pred = jnp.squeeze(pred_masks, axis=2)
    msz = [(int(t[0]), int(t[1])) for t in list(max_target_sizes)]
    osz = [(int(t[0]), int(t[1])) for t in list(orig_target_sizes)]
    max_h = max(h for h, _ in msz)
    max_w = max(w for _, w in msz)
    out = []
    for i in range(pred.shape[0]):
        up = _ref_bilinear(pred[i], max_h, max_w)
        m = (jax.nn.sigmoid(up) > threshold).astype(jnp.float32)
        img_h, img_w = msz[i]
        orig_h, orig_w = osz[i]
        m = m[:, :img_h, :img_w]
        o = _ref_nearest(m, orig_h, orig_w)
        out.append(o.astype(jnp.uint8)[:, None, :, :])
    return out


# ---------------------------------------------------------------------------
if __name__ == "__main__":
    key = jax.random.PRNGKey(0)
    B, Q, H, W = 2, 4, 16, 16

    pred_masks = jax.random.normal(key, (B, Q, 1, H, W), dtype=jnp.float32) * 2.0
    outputs = {'pred_masks': pred_masks}
    max_target_sizes = jnp.array([[24, 30], [28, 32]], dtype=jnp.int32)
    orig_target_sizes = jnp.array([[48, 60], [56, 64]], dtype=jnp.int32)
    results = [{} for _ in range(B)]

    module = PostProcessSegm(threshold=0.5)
    results = module(results, outputs, orig_target_sizes, max_target_sizes)
    for r in results:
        r['masks'] = jax.block_until_ready(r['masks'])

    # correctness check against a gather-based pure-JAX reference
    ref = _ref_post_process(pred_masks, orig_target_sizes, max_target_sizes, 0.5)
    for i in range(B):
        out_i = results[i]['masks']
        ref_i = ref[i]
        assert out_i.shape == ref_i.shape, (out_i.shape, ref_i.shape)
        assert out_i.dtype == jnp.uint8
        mismatch = float(jnp.mean((out_i != ref_i).astype(jnp.float32)))
        # binary masks: allow only a vanishing fraction of threshold-boundary flips
        assert mismatch < 5e-3, mismatch

    print("KERNEL_OK")
</pallas_src>

<mosaic_0001>
module attributes {stable_mosaic.version = 11 : i64} {
  func.func @_segm_kernel(%arg0: i32, %arg1: i32, %arg2: memref<1x4x16x16xf32, #tpu.memory_space<vmem>>, %arg3: memref<1x64x16xf32, #tpu.memory_space<vmem>>, %arg4: memref<1x16x128xf32, #tpu.memory_space<vmem>>, %arg5: memref<1x4x64x128xi8, #tpu.memory_space<vmem>>, %arg6: memref<4x64x16xf32, #tpu.memory_space<vmem>>) attributes {dimension_semantics = [#tpu.dimension_semantics<parallel>, #tpu.dimension_semantics<parallel>], iteration_bounds = array<i64: 2, 1>, scalar_prefetch = 0 : i64, scratch_operands = 1 : i64, tpu.core_type = #tpu.core_type<tc>, window_params = [{transform_indices = @transform_0, window_bounds = array<i64: 1, 4, 16, 16>}, {transform_indices = @transform_1, window_bounds = array<i64: 1, 64, 16>}, {transform_indices = @transform_2, window_bounds = array<i64: 1, 16, 128>}, {transform_indices = @transform_3, window_bounds = array<i64: 1, 4, 64, 128>}]} {
    %c0 = arith.constant 0 : index
    %c0_0 = arith.constant 0 : index
    %c0_1 = arith.constant 0 : index
    %0 = vector.load %arg3[%c0, %c0_0, %c0_1] : memref<1x64x16xf32, #tpu.memory_space<vmem>>, vector<1x64x16xf32>
    %1 = vector.shape_cast %0 : vector<1x64x16xf32> to vector<64x16xf32>
    %c0_2 = arith.constant 0 : index
    %c0_3 = arith.constant 0 : index
    %c0_4 = arith.constant 0 : index
    %c0_5 = arith.constant 0 : index
    %2 = vector.load %arg2[%c0_2, %c0_3, %c0_4, %c0_5] : memref<1x4x16x16xf32, #tpu.memory_space<vmem>>, vector<1x1x16x16xf32>
    %3 = vector.shape_cast %2 : vector<1x1x16x16xf32> to vector<16x16xf32>
    %cst = arith.constant dense<0.000000e+00> : vector<64x16xf32>
    %4 = tpu.matmul %1, %3, %cst {dimension_numbers = #tpu.dot_dimension_numbers<[1], [0], [0], [1], [0, 0, 1, 1], [], []>} : vector<64x16xf32>, vector<16x16xf32>, vector<64x16xf32> -> vector<64x16xf32>
    %c0_6 = arith.constant 0 : index
    %c0_7 = arith.constant 0 : index
    %c0_8 = arith.constant 0 : index
    %5 = vector.load %arg6[%c0_6, %c0_7, %c0_8] : memref<4x64x16xf32, #tpu.memory_space<vmem>>, vector<1x64x16xf32>
    %6 = vector.shape_cast %5 : vector<1x64x16xf32> to vector<64x16xf32>
    %7 = vector.shape_cast %4 : vector<64x16xf32> to vector<1x64x16xf32>
    tpu.vector_store %arg6[%c0_6, %c0_7, %c0_8], %7 {strides = array<i32>} : memref<4x64x16xf32, #tpu.memory_space<vmem>>, vector<1x64x16xf32>,
    %c0_9 = arith.constant 0 : index
    %c1 = arith.constant 1 : index
    %c0_10 = arith.constant 0 : index
    %c0_11 = arith.constant 0 : index
    %8 = vector.load %arg2[%c0_9, %c1, %c0_10, %c0_11] : memref<1x4x16x16xf32, #tpu.memory_space<vmem>>, vector<1x1x16x16xf32>
    %9 = vector.shape_cast %8 : vector<1x1x16x16xf32> to vector<16x16xf32>
    %cst_12 = arith.constant dense<0.000000e+00> : vector<64x16xf32>
    %10 = tpu.matmul %1, %9, %cst_12 {dimension_numbers = #tpu.dot_dimension_numbers<[1], [0], [0], [1], [0, 0, 1, 1], [], []>} : vector<64x16xf32>, vector<16x16xf32>, vector<64x16xf32> -> vector<64x16xf32>
    %c1_13 = arith.constant 1 : index
    %c0_14 = arith.constant 0 : index
    %c0_15 = arith.constant 0 : index
    %11 = vector.load %arg6[%c1_13, %c0_14, %c0_15] : memref<4x64x16xf32, #tpu.memory_space<vmem>>, vector<1x64x16xf32>
    %12 = vector.shape_cast %11 : vector<1x64x16xf32> to vector<64x16xf32>
    %13 = vector.shape_cast %10 : vector<64x16xf32> to vector<1x64x16xf32>
    tpu.vector_store %arg6[%c1_13, %c0_14, %c0_15], %13 {strides = array<i32>} : memref<4x64x16xf32, #tpu.memory_space<vmem>>, vector<1x64x16xf32>,
    %c0_16 = arith.constant 0 : index
    %c2 = arith.constant 2 : index
    %c0_17 = arith.constant 0 : index
    %c0_18 = arith.constant 0 : index
    %14 = vector.load %arg2[%c0_16, %c2, %c0_17, %c0_18] : memref<1x4x16x16xf32, #tpu.memory_space<vmem>>, vector<1x1x16x16xf32>
    %15 = vector.shape_cast %14 : vector<1x1x16x16xf32> to vector<16x16xf32>
    %cst_19 = arith.constant dense<0.000000e+00> : vector<64x16xf32>
    %16 = tpu.matmul %1, %15, %cst_19 {dimension_numbers = #tpu.dot_dimension_numbers<[1], [0], [0], [1], [0, 0, 1, 1], [], []>} : vector<64x16xf32>, vector<16x16xf32>, vector<64x16xf32> -> vector<64x16xf32>
    %c2_20 = arith.constant 2 : index
    %c0_21 = arith.constant 0 : index
    %c0_22 = arith.constant 0 : index
    %17 = vector.load %arg6[%c2_20, %c0_21, %c0_22] : memref<4x64x16xf32, #tpu.memory_space<vmem>>, vector<1x64x16xf32>
    %18 = vector.shape_cast %17 : vector<1x64x16xf32> to vector<64x16xf32>
    %19 = vector.shape_cast %16 : vector<64x16xf32> to vector<1x64x16xf32>
    tpu.vector_store %arg6[%c2_20, %c0_21, %c0_22], %19 {strides = array<i32>} : memref<4x64x16xf32, #tpu.memory_space<vmem>>, vector<1x64x16xf32>,
    %c0_23 = arith.constant 0 : index
    %c3 = arith.constant 3 : index
    %c0_24 = arith.constant 0 : index
    %c0_25 = arith.constant 0 : index
    %20 = vector.load %arg2[%c0_23, %c3, %c0_24, %c0_25] : memref<1x4x16x16xf32, #tpu.memory_space<vmem>>, vector<1x1x16x16xf32>
    %21 = vector.shape_cast %20 : vector<1x1x16x16xf32> to vector<16x16xf32>
    %cst_26 = arith.constant dense<0.000000e+00> : vector<64x16xf32>
    %22 = tpu.matmul %1, %21, %cst_26 {dimension_numbers = #tpu.dot_dimension_numbers<[1], [0], [0], [1], [0, 0, 1, 1], [], []>} : vector<64x16xf32>, vector<16x16xf32>, vector<64x16xf32> -> vector<64x16xf32>
    %c3_27 = arith.constant 3 : index
    %c0_28 = arith.constant 0 : index
    %c0_29 = arith.constant 0 : index
    %23 = vector.load %arg6[%c3_27, %c0_28, %c0_29] : memref<4x64x16xf32, #tpu.memory_space<vmem>>, vector<1x64x16xf32>
    %24 = vector.shape_cast %23 : vector<1x64x16xf32> to vector<64x16xf32>
    %25 = vector.shape_cast %22 : vector<64x16xf32> to vector<1x64x16xf32>
    tpu.vector_store %arg6[%c3_27, %c0_28, %c0_29], %25 {strides = array<i32>} : memref<4x64x16xf32, #tpu.memory_space<vmem>>, vector<1x64x16xf32>,
    %c0_30 = arith.constant 0 : index
    %c0_31 = arith.constant 0 : index
    %c0_32 = arith.constant 0 : index
    %26 = vector.load %arg6[%c0_30, %c0_31, %c0_32] : memref<4x64x16xf32, #tpu.memory_space<vmem>>, vector<4x64x16xf32>
    %27 = vector.shape_cast %26 : vector<4x64x16xf32> to vector<256x16xf32>
    %c0_33 = arith.constant 0 : index
    %c0_34 = arith.constant 0 : index
    %c0_35 = arith.constant 0 : index
    %28 = vector.load %arg4[%c0_33, %c0_34, %c0_35] : memref<1x16x128xf32, #tpu.memory_space<vmem>>, vector<1x16x128xf32>
    %29 = vector.shape_cast %28 : vector<1x16x128xf32> to vector<16x128xf32>
    %cst_36 = arith.constant dense<0.000000e+00> : vector<256x128xf32>
    %30 = tpu.matmul %27, %29, %cst_36 {dimension_numbers = #tpu.dot_dimension_numbers<[1], [0], [0], [1], [0, 0, 1, 1], [], []>} : vector<256x16xf32>, vector<16x128xf32>, vector<256x128xf32> -> vector<256x128xf32>
    %31 = vector.shape_cast %30 : vector<256x128xf32> to vector<4x64x128xf32>
    %cst_37 = arith.constant 0.000000e+00 : f32
    %32 = vector.broadcast %cst_37 : f32 to vector<4x64x128xf32>
    %33 = arith.cmpf ogt, %31, %32 : vector<4x64x128xf32>
    %34 = arith.extui %33 : vector<4x64x128xi1> to vector<4x64x128xi8>
    %c0_38 = arith.constant 0 : index
    %c0_39 = arith.constant 0 : index
    %c0_40 = arith.constant 0 : index
    %c0_41 = arith.constant 0 : index
    %35 = vector.load %arg5[%c0_38, %c0_39, %c0_40, %c0_41] : memref<1x4x64x128xi8, #tpu.memory_space<vmem>>, vector<1x4x64x128xi8>
    %36 = vector.shape_cast %35 : vector<1x4x64x128xi8> to vector<4x64x128xi8>
    %37 = vector.shape_cast %34 : vector<4x64x128xi8> to vector<1x4x64x128xi8>
    tpu.vector_store %arg5[%c0_38, %c0_39, %c0_40, %c0_41], %37 {strides = array<i32>} : memref<1x4x64x128xi8, #tpu.memory_space<vmem>>, vector<1x4x64x128xi8>,
    return
  }
  func.func @transform_0(%arg0: i32, %arg1: i32) -> (i32, i32, i32, i32) {
    %c0_i32 = arith.constant 0 : i32
    %c0_i32_0 = arith.constant 0 : i32
    %c0_i32_1 = arith.constant 0 : i32
    return %arg0, %arg1, %c0_i32, %c0_i32_0 : i32, i32, i32, i32
  }
  func.func @transform_1(%arg0: i32, %arg1: i32) -> (i32, i32, i32) {
    %c0_i32 = arith.constant 0 : i32
    %c0_i32_0 = arith.constant 0 : i32
    %c0_i32_1 = arith.constant 0 : i32
    return %arg0, %c0_i32, %c0_i32_0 : i32, i32, i32
  }
  func.func @transform_2(%arg0: i32, %arg1: i32) -> (i32, i32, i32) {
    %c0_i32 = arith.constant 0 : i32
    %c0_i32_0 = arith.constant 0 : i32
    %c0_i32_1 = arith.constant 0 : i32
    return %arg0, %c0_i32, %c0_i32_0 : i32, i32, i32
  }
  func.func @transform_3(%arg0: i32, %arg1: i32) -> (i32, i32, i32, i32) {
    %c0_i32 = arith.constant 0 : i32
    %c0_i32_0 = arith.constant 0 : i32
    %c0_i32_1 = arith.constant 0 : i32
    return %arg0, %arg1, %c0_i32, %c0_i32_0 : i32, i32, i32, i32
  }
}

</mosaic_0001>

<bundles_post_ra>
// kernel: tpu_custom_call.1
= control target key start
LH: loop header
LB: loop body
LE: loop exit
PB: predicated region body
PF: predicated region fallthrough
CT: control target
= control target key end

     0   :  { %8 = vsyncpa [#allocation4], 0  ;;  %s2025_s0 = inlined_call_operand.vmem [shape: f32[2,4,16,16], index: 0, kind: input, shape index: {}]   ;;  %s2026_s1 = inlined_call_operand.vmem [shape: f32[2,64,16], index: 1, kind: input, shape index: {}]   ;;  %s2027_s2 = inlined_call_operand.vmem [shape: f32[2,16,128], index: 2, kind: input, shape index: {}]   ;;  %s2028_s3 = inlined_call_operand.hbm [shape: u8[2,4,64,128], index: 3, kind: output, shape index: {}]  }
   0x1   :  { %10 = vsyncpa [#allocation4 + $0x1], 0  ;;  %s1759_s12 = smov 0   ;;  %s1761_s13 = smov 0  }
   0x2   :  { %s1763_s14 = smov 0   ;;  %s1765_s15 = smov 0  }
   0x3   :  { %s1767_s16 = smov 0   ;;  %s1769_s17 = smov 0  }
   0x4 LB: > { %s1294_s18 = sadd.s32 4294967295, %s1733_s17   ;;  %s1295_s19 = sadd.s32 4294967294, %s1733_s17   ;;  %s1733_s17 = sphi %s1769_s17, %s16_s17   ;;  %s1729_s16 = sphi %s1767_s16, %s2039_s16   ;;  %s1725_s15 = sphi %s1765_s15, %s2038_s15   ;;  %s1721_s14 = sphi %s1763_s14, %s2037_s14   ;;  %s1717_s13 = sphi %s1761_s13, %s2036_s13   ;;  %s1713_s12 = sphi %s1759_s12, %s2035_s12  }
   0x5   : > { %s28_s20 = sadd.s32 1, %s1729_s16  ;;  %s117_s21 = sadd.s32 1, %s1721_s14 }
   0x6   : > { %p30_p0 = scmp.ge.s32.totalorder %s28_s20, 2  ;;  %p127_p1 = scmp.ne.s32.totalorder %s1721_s14, %s1717_s13 }
   0x7   : > { %p128_p2 = scmp.eq.s32.totalorder %s1294_s18, 1  ;;  %p133_p3 = scmp.ne.s32.totalorder %s1717_s13, %s1713_s12 }
   0x8   : > { %s2041_s20 = smov (%p30_p0, %s28_s20), 0  ;;  %p134_p5 = scmp.eq.s32.totalorder %s1295_s19, 1 }
   0x9   : > { %p1799_p4 = por %p128_p2, %p127_p1  ;;  %s112_s23 = ssub.s32 %s1729_s16, %s2041_s20 }
   0xa   : > { %p1298_p6 = scmp.ge.s32.totalorder %s1733_s17, 1  ;;  %p115_p7 = scmp.eq.s32.totalorder %s112_s23, 0 }
   0xb   : > { %p1806_p8 = por %p134_p5, %p133_p3  ;;  %p182_p9 = scmp.lt.s32.totalorder %s1733_s17, 3 }
   0xc   : > { %s1812_s25 = scalar_select %p115_p7, %s1721_s14, %s117_s21  }
   0xd   : > { %p183_p10 = pnand %p1298_p6, %p182_p9 }
   0xe   : > { %p222_p11 = scmp.lt.s32.totalorder (!%p183_p10), %s1725_s15, 1  ;;  %vm255_vm0 = vcmask (!%p183_p10), 130048   ;;  %s218_s11 = sand.u32 (!%p183_p10), 1, %s1717_s13  }
   0xf   : > { %186 = sbr.rel (%p183_p10) target bundleno = 531 (0x213), region = 32  ;;  %s1299_s18 = sshll.u32 (!%p183_p10), %s218_s11, 6 }
  0x10   : > { %s1939_s19 = scalar_lea.vmem (!%p183_p10), [#allocation3], %s1299_s18  ;;  %s1384_s21 = sshll.u32 (!%p183_p10), %s1725_s15, 10 }
  0x11   : > { %s1188_s23 = sshll.u32 (!%p183_p10), %s1939_s19, 4  ;;  %s1971_s28 = scalar_lea.hbm (!%p183_p10), %s2028_s3, %s1384_s21  ;;  %s1973_s23 = int_to_ptr.vmem [resolvable:$true] %s1188_s23 }
  0x12   : > { %s1655_s29 = scalar_lea.vmem (!%p183_p10), %s1973_s23, 1024 }
  0x13   : > { %p1656_p12 = scmp.ne.s32.totalorder (!%p183_p10), %s1973_s23, %s1655_s29 }
  0x15   : > { %p1657_p13 = pnand (!%p183_p10), %p1656_p12, %p1799_p4 }
  0x16   : > { %s1816_s26 = scalar_select %p222_p11, %s1725_s15, 1 }
  0x17   : > { %s1979_s15 = scalar_lea.sflag [#allocation4], %s218_s11  ;;  %p1658_p0 = pneg %p1657_p13 }
  0x18   : > { %s1381_s27 = sshll.u32 %s1816_s26, 6  ;;  %s1383_s7 = sshll.u32 %s1816_s26, 4 }
  0x19   : > { %s230_s30 = scalar_lea.vmem %s2025_s0, %s1381_s27  ;;  %s1825_s6 = scalar_lea.vmem %s2026_s1, %s1381_s27 }
  0x1a   : > { %v253_v0 = vld [vmem:[%s230_s30] sm:$0xff]  ;;  %v254_v1 = vld [vmem:[%s230_s30 + $0x8] sm:$0xff]  ;;  %v1314_v8 = vld [vmem:[%s230_s30 + $0x10] sm:$0xff]  ;;  %s241_s10 = scalar_lea.vmem %s2027_s2, %s1383_s7 }
  0x1b   : > { %v245_v2 = vld [vmem:[%s1825_s6] sm:$0xff]  ;;  %v1575_v3 = vpack.c.bf16 %v254_v1, %v253_v0  ;;  %v1325_v5 = vld [vmem:[%s230_s30 + $0x28] sm:$0xff]  ;;  %v1315_v9 = vld [vmem:[%s230_s30 + $0x18] sm:$0xff] }
  0x1c   : > { %1463 = vmatprep.mubr.msk.f32.mxu0 %vm255_vm0, %v245_v2  ;;  %v1324_v4 = vld [vmem:[%s230_s30 + $0x20] sm:$0xff]  ;;  %1479 = vmatprep.mubr.msk.f32.mxu1 %vm255_vm0, %v245_v2  ;;  %v246_v7 = vld [vmem:[%s1825_s6 + $0x8] sm:$0xff]  ;;  %v1334_v10 = vld [vmem:[%s230_s30 + $0x30] sm:$0xff]  ;;  %v1579_v12 = vpack.c.bf16 %v1315_v9, %v1314_v8 }
  0x1d   : > { %v1583_v6 = vpack.c.bf16 %v1325_v5, %v1324_v4  ;;  %1576 = vmatprep.subr.bf16.mxu0 %v1575_v3  ;;  %v247_v11 = vld [vmem:[%s1825_s6 + $0x10] sm:$0xff]  ;;  %v1335_v13 = vld [vmem:[%s230_s30 + $0x38] sm:$0xff]  ;;  %v249_v16 = vld [vmem:[%s1825_s6 + $0x20] sm:$0xff]  ;;  %s1736_s30 = smov [#allocation3]  }
  0x1e   : > { %1578 = vmatpush3.bf16.msra.mxu0 %v1575_v3  ;;  %v1587_v14 = vpack.c.bf16 %v1335_v13, %v1334_v10  ;;  %1580 = vmatprep.subr.bf16.mxu1 %v1579_v12  ;;  %v248_v15 = vld [vmem:[%s1825_s6 + $0x18] sm:$0xff]  ;;  %v250_v17 = vld [vmem:[%s1825_s6 + $0x28] sm:$0xff]  ;;  %v251_v18 = vld [vmem:[%s1825_s6 + $0x30] sm:$0xff]  ;;  %s1659_s4 = sshll.u32 %s1736_s30, 4  ;;  %s1660_s4 = int_to_ptr.vmem [resolvable:$false] %s1659_s4 }
  0x1f   : > { %1584 = vmatprep.subr.bf16.mxu0 %v1583_v6  ;;  %1582 = vmatpush3.bf16.msra.mxu1 %v1579_v12  ;;  %v252_v19 = vld [vmem:[%s1825_s6 + $0x38] sm:$0xff]  ;;  %v776_v20 = vld [vmem:[%s241_s10] sm:$0xff]  ;;  %v777_v21 = vld [vmem:[%s241_s10 + $0x8] sm:$0xff]  ;;  %s1661_s5 = scalar_lea.vmem %s1660_s4, 2048  ;;  %p1662_p1 = scmp.lt.s32.totalorder %s1973_s23, %s1660_s4 }
  0x20   : > { %1588 = vmatprep.subr.bf16.mxu1 %v1587_v14  ;;  %v1591_v22 = vpack.c.bf16 %v777_v21, %v776_v20  ;;  %p1663_p2 = scmp.lt.s32.totalorder %s1661_s5, %s1655_s29 }
  0x21   : > { %1464 = vmatmul.mubr.msk.f32.vlgmr.msra.gmra.mrb[0].mxu0 %vm255_vm0, %v246_v7 }
  0x22   : > { %1586 = vmatpush3.bf16.msra.mxu0 %v1583_v6  ;;  %1466 = vmatprep.mubr.msk.f32.mxu0 %vm255_vm0, %v247_v11  ;;  %p1664_p3 = por %p1663_p2, %p1662_p1 }
  0x23   : > { %1480 = vmatmul.mubr.msk.f32.vlgmr.msra.gmra.mrb[0].mxu1 %vm255_vm0, %v246_v7  ;;  %1592 = vmatprep.subr.bf16.mxu0 %v1591_v22 }
  0x24   : > { %1590 = vmatpush3.bf16.msra.mxu1 %v1587_v14  ;;  %1482 = vmatprep.mubr.msk.f32.mxu1 %vm255_vm0, %v247_v11  ;;  %p1665_p5 = pnand %p1664_p3, %p1658_p0 }
  0x25   : > { %1467 = vmatmul.mubr.msk.f32.gmra.mrb[2].mxu0 %vm255_vm0, %v248_v15  ;;  %1595 = vmatprep.subr.bf16.mxu1 %v1591_v22 }
  0x26   : > { %1469 = vmatprep.mubr.msk.f32.mxu0 %vm255_vm0, %v249_v16 }
  0x27   : > { %1483 = vmatmul.mubr.msk.f32.gmra.mrb[2].mxu1 %vm255_vm0, %v248_v15 }
  0x28   : > { %1485 = vmatprep.mubr.msk.f32.mxu1 %vm255_vm0, %v249_v16 }
  0x29   : > { %1470 = vmatmul.mubr.msk.f32.gmra.mrb[4].mxu0 %vm255_vm0, %v250_v17 }
  0x2a   : > { %1472 = vmatprep.mubr.msk.f32.mxu0 %vm255_vm0, %v251_v18 }
  0x2b   : > { %1486 = vmatmul.mubr.msk.f32.gmra.mrb[4].mxu1 %vm255_vm0, %v250_v17 }
  0x2c   : > { %1488 = vmatprep.mubr.msk.f32.mxu1 %vm255_vm0, %v251_v18 }
  0x2d   : > { %1473 = vmatmul.mubr.msk.f32.gmra.mrb[6].mxu0 %vm255_vm0, %v252_v19 }
  0x2e   : > { %1495 = vmatprep.mubr.msk.f32.mxu0 %vm255_vm0, %v245_v2 }
  0x2f   : > { %1489 = vmatmul.mubr.msk.f32.gmra.mrb[6].mxu1 %vm255_vm0, %v252_v19 }
  0x30   : > { %1511 = vmatprep.mubr.msk.f32.mxu1 %vm255_vm0, %v245_v2 }
  0x31   : > { %1496 = vmatmul.mubr.msk.f32.vlgmr.msra.gmra.mrb[8].mxu0 %vm255_vm0, %v246_v7 }
  0x32   : > { %1498 = vmatprep.mubr.msk.f32.mxu0 %vm255_vm0, %v247_v11  ;;  %1594 = vmatpush3.bf16.msra.mxu0 %v1591_v22 }
  0x33   : > { %1512 = vmatmul.mubr.msk.f32.vlgmr.msra.gmra.mrb[8].mxu1 %vm255_vm0, %v246_v7 }
  0x34   : > { %1514 = vmatprep.mubr.msk.f32.mxu1 %vm255_vm0, %v247_v11  ;;  %1596 = vmatpush3.bf16.msra.mxu1 %v1591_v22 }
  0x35   : > { %1499 = vmatmul.mubr.msk.f32.gmra.mrb[10].mxu0 %vm255_vm0, %v248_v15 }
  0x36   : > { %1501 = vmatprep.mubr.msk.f32.mxu0 %vm255_vm0, %v249_v16 }
  0x37   : > { %1515 = vmatmul.mubr.msk.f32.gmra.mrb[10].mxu1 %vm255_vm0, %v248_v15 }
  0x38   : > { %1517 = vmatprep.mubr.msk.f32.mxu1 %vm255_vm0, %v249_v16 }
  0x39   : > { %1502 = vmatmul.mubr.msk.f32.gmra.mrb[12].mxu0 %vm255_vm0, %v250_v17 }
  0x3a   : > { %1504 = vmatprep.mubr.msk.f32.mxu0 %vm255_vm0, %v251_v18 }
  0x3b   : > { %1518 = vmatmul.mubr.msk.f32.gmra.mrb[12].mxu1 %vm255_vm0, %v250_v17 }
  0x3c   : > { %1520 = vmatprep.mubr.msk.f32.mxu1 %vm255_vm0, %v251_v18 }
  0x3d   : > { %1505 = vmatmul.mubr.msk.f32.gmra.mrb[14].mxu0 %vm255_vm0, %v252_v19 }
  0x3f   : > { %1521 = vmatmul.mubr.msk.f32.gmra.mrb[14].mxu1 %vm255_vm0, %v252_v19 }
  0xf4   : > { %v1465_v23 = vpop.f32.mrb[0].mxu0 }
  0xf5   : > { %386 = vst.msk [vmem:[#allocation2 + $0x8] sm:$0xff] %vm255_vm0, %v1465_v23  ;;  %v346_v24 = vpop.f32.mrb[1].mxu0 }
  0xf6   : > { %385 = vst.msk [vmem:[#allocation2] sm:$0xff] %vm255_vm0, %v346_v24  ;;  %v1481_v27 = vpop.f32.mrb[0].mxu1 }
  0xf7   : > { %503 = vst.msk [vmem:[#allocation2 + $0x48] sm:$0xff] %vm255_vm0, %v1481_v27  ;;  %v462_v28 = vpop.f32.mrb[1].mxu1 }
  0xf8   : > { %v1468_v25 = vpop.f32.mrb[2].mxu0  ;;  %502 = vst.msk [vmem:[#allocation2 + $0x40] sm:$0xff] %vm255_vm0, %v462_v28  ;;  %v1735_v28 = vmov 0  }
  0xf9   : > { %388 = vst.msk [vmem:[#allocation2 + $0x18] sm:$0xff] %vm255_vm0, %v1468_v25  ;;  %v356_v26 = vpop.f32.mrb[3].mxu0 }
  0xfa   : > { %387 = vst.msk [vmem:[#allocation2 + $0x10] sm:$0xff] %vm255_vm0, %v356_v26  ;;  %v1484_v32 = vpop.f32.mrb[2].mxu1 }
  0xfb   : > { %505 = vst.msk [vmem:[#allocation2 + $0x58] sm:$0xff] %vm255_vm0, %v1484_v32  ;;  %v472_v34 = vpop.f32.mrb[3].mxu1 }
  0xfc   : > { %v1471_v29 = vpop.f32.mrb[4].mxu0  ;;  %v745_v33 = vld [vmem:[#allocation2 + $0x8] sm:$0xff]  ;;  %504 = vst.msk [vmem:[#allocation2 + $0x50] sm:$0xff] %vm255_vm0, %v472_v34 }
  0xfd   : > { %390 = vst.msk [vmem:[#allocation2 + $0x28] sm:$0xff] %vm255_vm0, %v1471_v29  ;;  %v366_v30 = vpop.f32.mrb[5].mxu0  ;;  %v744_v31 = vld [vmem:[#allocation2] sm:$0xff] }
  0xfe   : > { %389 = vst.msk [vmem:[#allocation2 + $0x20] sm:$0xff] %vm255_vm0, %v366_v30  ;;  %1527 = vmatprep.mubr.msk.f32.mxu0 %vm255_vm0, %v744_v31  ;;  %v1487_v38 = vpop.f32.mrb[4].mxu1  ;;  %v753_v59 = vld [vmem:[#allocation2 + $0x48] sm:$0xff] }
  0xff   : > { %1528 = vmatmul.mubr.msk.f32.vlgmr.msra.gmra.mrb[16].mxu0 %vm255_vm0, %v745_v33  ;;  %507 = vst.msk [vmem:[#allocation2 + $0x68] sm:$0xff] %vm255_vm0, %v1487_v38  ;;  %v482_v40 = vpop.f32.mrb[5].mxu1  ;;  %v752_v50 = vld [vmem:[#allocation2 + $0x40] sm:$0xff] }
 0x100   : > { %v1474_v35 = vpop.f32.mrb[6].mxu0  ;;  %v747_v39 = vld [vmem:[#allocation2 + $0x18] sm:$0xff]  ;;  %506 = vst.msk [vmem:[#allocation2 + $0x60] sm:$0xff] %vm255_vm0, %v482_v40 }
 0x101   : > { %392 = vst.msk [vmem:[#allocation2 + $0x38] sm:$0xff] %vm255_vm0, %v1474_v35  ;;  %v376_v36 = vpop.f32.mrb[7].mxu0  ;;  %v746_v37 = vld [vmem:[#allocation2 + $0x10] sm:$0xff] }
 0x102   : > { %391 = vst.msk [vmem:[#allocation2 + $0x30] sm:$0xff] %vm255_vm0, %v376_v36  ;;  %1530 = vmatprep.mubr.msk.f32.mxu0 %vm255_vm0, %v746_v37  ;;  %v1490_v44 = vpop.f32.mrb[6].mxu1  ;;  %v755_v3 = vld [vmem:[#allocation2 + $0x58] sm:$0xff] }
 0x103   : > { %1531 = vmatmul.mubr.msk.f32.gmra.mrb[18].mxu0 %vm255_vm0, %v747_v39  ;;  %509 = vst.msk [vmem:[#allocation2 + $0x78] sm:$0xff] %vm255_vm0, %v1490_v44  ;;  %v492_v46 = vpop.f32.mrb[7].mxu1  ;;  %v754_v57 = vld [vmem:[#allocation2 + $0x50] sm:$0xff] }
 0x104   : > { %v1497_v41 = vpop.f32.mrb[8].mxu0  ;;  %v749_v45 = vld [vmem:[#allocation2 + $0x28] sm:$0xff]  ;;  %508 = vst.msk [vmem:[#allocation2 + $0x70] sm:$0xff] %vm255_vm0, %v492_v46 }
 0x105   : > { %620 = vst.msk [vmem:[#allocation2 + $0x88] sm:$0xff] %vm255_vm0, %v1497_v41  ;;  %v579_v42 = vpop.f32.mrb[9].mxu0  ;;  %v748_v43 = vld [vmem:[#allocation2 + $0x20] sm:$0xff] }
 0x106   : > { %619 = vst.msk [vmem:[#allocation2 + $0x80] sm:$0xff] %vm255_vm0, %v579_v42  ;;  %1533 = vmatprep.mubr.msk.f32.mxu0 %vm255_vm0, %v748_v43  ;;  %v1513_v51 = vpop.f32.mrb[8].mxu1  ;;  %v757_v9 = vld [vmem:[#allocation2 + $0x68] sm:$0xff] }
 0x107   : > { %1534 = vmatmul.mubr.msk.f32.gmra.mrb[20].mxu0 %vm255_vm0, %v749_v45  ;;  %737 = vst.msk [vmem:[#allocation2 + $0xc8] sm:$0xff] %vm255_vm0, %v1513_v51  ;;  %v696_v53 = vpop.f32.mrb[9].mxu1  ;;  %v756_v1 = vld [vmem:[#allocation2 + $0x60] sm:$0xff] }
 0x108   : > { %v1500_v47 = vpop.f32.mrb[10].mxu0  ;;  %v751_v52 = vld [vmem:[#allocation2 + $0x38] sm:$0xff]  ;;  %736 = vst.msk [vmem:[#allocation2 + $0xc0] sm:$0xff] %vm255_vm0, %v696_v53 }
 0x109   : > { %622 = vst.msk [vmem:[#allocation2 + $0x98] sm:$0xff] %vm255_vm0, %v1500_v47  ;;  %v589_v48 = vpop.f32.mrb[11].mxu0  ;;  %v750_v49 = vld [vmem:[#allocation2 + $0x30] sm:$0xff] }
 0x10a   : > { %621 = vst.msk [vmem:[#allocation2 + $0x90] sm:$0xff] %vm255_vm0, %v589_v48  ;;  %1536 = vmatprep.mubr.msk.f32.mxu0 %vm255_vm0, %v750_v49  ;;  %v1516_v58 = vpop.f32.mrb[10].mxu1  ;;  %v759_v14 = vld [vmem:[#allocation2 + $0x78] sm:$0xff] }
 0x10b   : > { %1537 = vmatmul.mubr.msk.f32.gmra.mrb[22].mxu0 %vm255_vm0, %v751_v52  ;;  %739 = vst.msk [vmem:[#allocation2 + $0xd8] sm:$0xff] %vm255_vm0, %v1516_v58  ;;  %v706_v61 = vpop.f32.mrb[11].mxu1  ;;  %v758_v7 = vld [vmem:[#allocation2 + $0x70] sm:$0xff] }
 0x10c   : > { %v1503_v54 = vpop.f32.mrb[12].mxu0  ;;  %1539 = vmatprep.mubr.msk.f32.mxu0 %vm255_vm0, %v752_v50  ;;  %v761_v60 = vld [vmem:[#allocation2 + $0x88] sm:$0xff]  ;;  %738 = vst.msk [vmem:[#allocation2 + $0xd0] sm:$0xff] %vm255_vm0, %v706_v61 }
 0x10d   : > { %624 = vst.msk [vmem:[#allocation2 + $0xa8] sm:$0xff] %vm255_vm0, %v1503_v54  ;;  %v599_v55 = vpop.f32.mrb[13].mxu0  ;;  %v760_v56 = vld [vmem:[#allocation2 + $0x80] sm:$0xff] }
 0x10e   : > { %623 = vst.msk [vmem:[#allocation2 + $0xa0] sm:$0xff] %vm255_vm0, %v599_v55  ;;  %1551 = vmatprep.mubr.msk.f32.mxu1 %vm255_vm0, %v760_v56  ;;  %v1519_v2 = vpop.f32.mrb[12].mxu1  ;;  %v769_v17 = vld [vmem:[#allocation2 + $0xc8] sm:$0xff] }
 0x10f   : > { %1540 = vmatmul.mubr.msk.f32.gmra.mrb[24].mxu0 %vm255_vm0, %v753_v59  ;;  %1552 = vmatmul.mubr.msk.f32.vlgmr.msra.gmra.mrb[16].mxu1 %vm255_vm0, %v761_v60  ;;  %741 = vst.msk [vmem:[#allocation2 + $0xe8] sm:$0xff] %vm255_vm0, %v1519_v2  ;;  %v716_v5 = vpop.f32.mrb[13].mxu1  ;;  %v768_v13 = vld [vmem:[#allocation2 + $0xc0] sm:$0xff] }
 0x110   : > { %v1506_v62 = vpop.f32.mrb[14].mxu0  ;;  %1542 = vmatprep.mubr.msk.f32.mxu0 %vm255_vm0, %v754_v57  ;;  %v763_v4 = vld [vmem:[#allocation2 + $0x98] sm:$0xff]  ;;  %740 = vst.msk [vmem:[#allocation2 + $0xe0] sm:$0xff] %vm255_vm0, %v716_v5 }
 0x111   : > { %626 = vst.msk [vmem:[#allocation2 + $0xb8] sm:$0xff] %vm255_vm0, %v1506_v62  ;;  %v609_v63 = vpop.f32.mrb[15].mxu0  ;;  %v762_v0 = vld [vmem:[#allocation2 + $0x90] sm:$0xff] }
 0x112   : > { %625 = vst.msk [vmem:[#allocation2 + $0xb0] sm:$0xff] %vm255_vm0, %v609_v63  ;;  %1554 = vmatprep.mubr.msk.f32.mxu1 %vm255_vm0, %v762_v0  ;;  %v1522_v8 = vpop.f32.mrb[14].mxu1  ;;  %v771_v19 = vld [vmem:[#allocation2 + $0xd8] sm:$0xff] }
 0x113   : > { %1543 = vmatmul.mubr.msk.f32.gmra.mrb[26].mxu0 %vm255_vm0, %v755_v3  ;;  %1555 = vmatmul.mubr.msk.f32.gmra.mrb[18].mxu1 %vm255_vm0, %v763_v4  ;;  %743 = vst.msk [vmem:[#allocation2 + $0xf8] sm:$0xff] %vm255_vm0, %v1522_v8  ;;  %v726_v11 = vpop.f32.mrb[15].mxu1  ;;  %v770_v16 = vld [vmem:[#allocation2 + $0xd0] sm:$0xff] }
 0x114   : > { %1545 = vmatprep.mubr.msk.f32.mxu0 %vm255_vm0, %v756_v1  ;;  %v765_v10 = vld [vmem:[#allocation2 + $0xa8] sm:$0xff]  ;;  %742 = vst.msk [vmem:[#allocation2 + $0xf0] sm:$0xff] %vm255_vm0, %v726_v11 }
 0x115   : > { %v764_v6 = vld [vmem:[#allocation2 + $0xa0] sm:$0xff] }
 0x116   : > { %1557 = vmatprep.mubr.msk.f32.mxu1 %vm255_vm0, %v764_v6  ;;  %v773_v21 = vld [vmem:[#allocation2 + $0xe8] sm:$0xff] }
 0x117   : > { %1546 = vmatmul.mubr.msk.f32.gmra.mrb[28].mxu0 %vm255_vm0, %v757_v9  ;;  %1558 = vmatmul.mubr.msk.f32.gmra.mrb[20].mxu1 %vm255_vm0, %v765_v10  ;;  %v772_v18 = vld [vmem:[#allocation2 + $0xe0] sm:$0xff] }
 0x118   : > { %1548 = vmatprep.mubr.msk.f32.mxu0 %vm255_vm0, %v758_v7  ;;  %v767_v15 = vld [vmem:[#allocation2 + $0xb8] sm:$0xff] }
 0x119   : > { %v766_v12 = vld [vmem:[#allocation2 + $0xb0] sm:$0xff] }
 0x11a   : > { %1560 = vmatprep.mubr.msk.f32.mxu1 %vm255_vm0, %v766_v12  ;;  %v775_v22 = vld [vmem:[#allocation2 + $0xf8] sm:$0xff] }
 0x11b   : > { %1549 = vmatmul.mubr.msk.f32.gmra.mrb[30].mxu0 %vm255_vm0, %v759_v14  ;;  %1561 = vmatmul.mubr.msk.f32.gmra.mrb[22].mxu1 %vm255_vm0, %v767_v15  ;;  %v774_v20 = vld [vmem:[#allocation2 + $0xf0] sm:$0xff] }
 0x11c   : > { %1563 = vmatprep.mubr.msk.f32.mxu1 %vm255_vm0, %v768_v13 }
 0x11f   : > { %1564 = vmatmul.mubr.msk.f32.gmra.mrb[24].mxu1 %vm255_vm0, %v769_v17 }
 0x120   : > { %1566 = vmatprep.mubr.msk.f32.mxu1 %vm255_vm0, %v770_v16 }
 0x123   : > { %1567 = vmatmul.mubr.msk.f32.gmra.mrb[26].mxu1 %vm255_vm0, %v771_v19 }
 0x124   : > { %1569 = vmatprep.mubr.msk.f32.mxu1 %vm255_vm0, %v772_v18 }
 0x127   : > { %1570 = vmatmul.mubr.msk.f32.gmra.mrb[28].mxu1 %vm255_vm0, %v773_v21 }
 0x128   : > { %1572 = vmatprep.mubr.msk.f32.mxu1 %vm255_vm0, %v774_v20 }
 0x12b   : > { %1573 = vmatmul.mubr.msk.f32.gmra.mrb[30].mxu1 %vm255_vm0, %v775_v22 }
 0x1d2   : > { %v1529_v23 = vpop.f32.mrb[16].mxu0 }
 0x1d3   : > { %vm1100_vm1 = vcmp.gt.f32.partialorder %v1529_v23, 0.0  ;;  %v940_v24 = vpop.f32.mrb[17].mxu0 }
 0x1d4   : > { %vm1099_vm2 = vcmp.gt.f32.partialorder %v940_v24, 0.0 }
 0x1d5   : > { %vm1131_vm3 = vmpackc.low %vm1100_vm1, %vm1099_vm2 }
 0x1d6   : > { %v1532_v25 = vpop.f32.mrb[18].mxu0 }
 0x1d7   : > { %vm1102_vm4 = vcmp.gt.f32.partialorder %v1532_v25, 0.0  ;;  %v950_v26 = vpop.f32.mrb[19].mxu0 }
 0x1d8   : > { %vm1101_vm5 = vcmp.gt.f32.partialorder %v950_v26, 0.0 }
 0x1d9   : > { %vm1132_vm6 = vmpackc.low %vm1102_vm4, %vm1101_vm5 }
 0x1da   : > { %vm1133_vm7 = vmpackc.even %vm1132_vm6, %vm1131_vm3  ;;  %v1535_v27 = vpop.f32.mrb[20].mxu0 }
 0x1db   : > { %v1155_v29 = vsel %vm1133_vm7, 16843009, %v1735_v28  ;;  %vm1104_vm8 = vcmp.gt.f32.partialorder %v1535_v27, 0.0  ;;  %v960_v30 = vpop.f32.mrb[21].mxu0 }
 0x1dc   : > { %1163 = vst [vmem:[%s1939_s19] sm:$0xff] %v1155_v29  ;;  %vm1103_vm9 = vcmp.gt.f32.partialorder %v960_v30, 0.0 }
 0x1dd   : > { %vm1134_vm10 = vmpackc.low %vm1104_vm8, %vm1103_vm9 }
 0x1de   : > { %v1538_v31 = vpop.f32.mrb[22].mxu0 }
 0x1df   : > { %vm1106_vm11 = vcmp.gt.f32.partialorder %v1538_v31, 0.0  ;;  %v970_v32 = vpop.f32.mrb[23].mxu0 }
 0x1e0   : > { %vm1105_vm12 = vcmp.gt.f32.partialorder %v970_v32, 0.0 }
 0x1e1   : > { %vm1135_vm13 = vmpackc.low %vm1106_vm11, %vm1105_vm12 }
 0x1e2   : > { %vm1136_vm14 = vmpackc.even %vm1135_vm13, %vm1134_vm10  ;;  %v1541_v33 = vpop.f32.mrb[24].mxu0  ;;  %v1553_v34 = vpop.f32.mrb[16].mxu1 }
 0x1e3   : > { %v1156_v35 = vsel %vm1136_vm14, 16843009, %v1735_v28  ;;  %vm1108_vm15 = vcmp.gt.f32.partialorder %v1541_v33, 0.0  ;;  %vm1116_vm0 = vcmp.gt.f32.partialorder %v1553_v34, 0.0  ;;  %v980_v36 = vpop.f32.mrb[25].mxu0  ;;  %v1020_v37 = vpop.f32.mrb[17].mxu1 }
 0x1e4   : > { %1164 = vst [vmem:[%s1939_s19 + $0x8] sm:$0xff] %v1156_v35  ;;  %vm1107_vm1 = vcmp.gt.f32.partialorder %v980_v36, 0.0  ;;  %vm1115_vm2 = vcmp.gt.f32.partialorder %v1020_v37, 0.0 }
 0x1e5   : > { %vm1137_vm3 = vmpackc.low %vm1108_vm15, %vm1107_vm1 }
 0x1e6   : > { %vm1944_vm4 = vmpackc.low %vm1116_vm0, %vm1115_vm2  ;;  %v1544_v39 = vpop.f32.mrb[26].mxu0  ;;  %v1556_v40 = vpop.f32.mrb[18].mxu1 }
 0x1e7   : > { %vm1110_vm5 = vcmp.gt.f32.partialorder %v1544_v39, 0.0  ;;  %v990_v41 = vpop.f32.mrb[27].mxu0  ;;  %v1030_v42 = vpop.f32.mrb[19].mxu1  ;;  %vm1118_vm6 = vcmp.gt.f32.partialorder %v1556_v40, 0.0 }
 0x1e8   : > { %vm1109_vm7 = vcmp.gt.f32.partialorder %v990_v41, 0.0  ;;  %vm1117_vm8 = vcmp.gt.f32.partialorder %v1030_v42, 0.0 }
 0x1e9   : > { %vm1138_vm9 = vmpackc.low %vm1110_vm5, %vm1109_vm7 }
 0x1ea   : > { %vm1139_vm10 = vmpackc.even %vm1138_vm9, %vm1137_vm3  ;;  %v1547_v43 = vpop.f32.mrb[28].mxu0  ;;  %v1559_v44 = vpop.f32.mrb[20].mxu1 }
 0x1eb   : > { %v1157_v45 = vsel %vm1139_vm10, 16843009, %v1735_v28  ;;  %vm1144_vm11 = vmpackc.low %vm1118_vm6, %vm1117_vm8  ;;  %vm1112_vm12 = vcmp.gt.f32.partialorder %v1547_v43, 0.0  ;;  %vm1120_vm13 = vcmp.gt.f32.partialorder %v1559_v44, 0.0  ;;  %v1000_v46 = vpop.f32.mrb[29].mxu0  ;;  %v1040_v47 = vpop.f32.mrb[21].mxu1 }
 0x1ec   : > { %1165 = vst [vmem:[%s1939_s19 + $0x10] sm:$0xff] %v1157_v45  ;;  %vm1145_vm14 = vmpackc.even %vm1144_vm11, %vm1944_vm4  ;;  %vm1111_vm15 = vcmp.gt.f32.partialorder %v1000_v46, 0.0  ;;  %vm1119_vm0 = vcmp.gt.f32.partialorder %v1040_v47, 0.0 }
 0x1ed   : > { %v1159_v48 = vsel %vm1145_vm14, 16843009, %v1735_v28  ;;  %vm1140_vm1 = vmpackc.low %vm1112_vm12, %vm1111_vm15 }
 0x1ee   : > { %1167 = vst [vmem:[%s1939_s19 + $0x20] sm:$0xff] %v1159_v48  ;;  %vm1954_vm2 = vmpackc.low %vm1120_vm13, %vm1119_vm0  ;;  %v1550_v50 = vpop.f32.mrb[30].mxu0  ;;  %v1562_v51 = vpop.f32.mrb[22].mxu1 }
 0x1ef   : > { %vm1114_vm3 = vcmp.gt.f32.partialorder %v1550_v50, 0.0  ;;  %v1010_v52 = vpop.f32.mrb[31].mxu0  ;;  %v1050_v53 = vpop.f32.mrb[23].mxu1  ;;  %vm1122_vm5 = vcmp.gt.f32.partialorder %v1562_v51, 0.0 }
 0x1f0   : > { %vm1113_vm6 = vcmp.gt.f32.partialorder %v1010_v52, 0.0  ;;  %vm1121_vm4 = vcmp.gt.f32.partialorder %v1050_v53, 0.0 }
 0x1f1   : > { %vm1141_vm7 = vmpackc.low %vm1114_vm3, %vm1113_vm6 }
 0x1f2   : > { %vm1142_vm8 = vmpackc.even %vm1141_vm7, %vm1140_vm1  ;;  %v1565_v54 = vpop.f32.mrb[24].mxu1 }
 0x1f3   : > { %v1158_v55 = vsel %vm1142_vm8, 16843009, %v1735_v28  ;;  %vm1147_vm9 = vmpackc.low %vm1122_vm5, %vm1121_vm4  ;;  %vm1124_vm10 = vcmp.gt.f32.partialorder %v1565_v54, 0.0  ;;  %v1060_v56 = vpop.f32.mrb[25].mxu1 }
 0x1f4   : > { %1166 = vst [vmem:[%s1939_s19 + $0x18] sm:$0xff] %v1158_v55  ;;  %vm1148_vm11 = vmpackc.even %vm1147_vm9, %vm1954_vm2  ;;  %vm1123_vm12 = vcmp.gt.f32.partialorder %v1060_v56, 0.0 }
 0x1f5   : > { %v1160_v57 = vsel %vm1148_vm11, 16843009, %v1735_v28  ;;  %vm1149_vm13 = vmpackc.low %vm1124_vm10, %vm1123_vm12 }
 0x1f6   : > { %1168 = vst [vmem:[%s1939_s19 + $0x28] sm:$0xff] %v1160_v57  ;;  %v1568_v58 = vpop.f32.mrb[26].mxu1 }
 0x1f7   : > { %vm1126_vm14 = vcmp.gt.f32.partialorder %v1568_v58, 0.0  ;;  %v1070_v59 = vpop.f32.mrb[27].mxu1 }
 0x1f8   : > { %vm1125_vm15 = vcmp.gt.f32.partialorder %v1070_v59, 0.0 }
 0x1f9   : > { %vm1150_vm0 = vmpackc.low %vm1126_vm14, %vm1125_vm15 }
 0x1fa   : > { %vm1151_vm1 = vmpackc.even %vm1150_vm0, %vm1149_vm13  ;;  %v1571_v60 = vpop.f32.mrb[28].mxu1 }
 0x1fb   : > { %v1161_v61 = vsel %vm1151_vm1, 16843009, %v1735_v28  ;;  %vm1128_vm3 = vcmp.gt.f32.partialorder %v1571_v60, 0.0  ;;  %v1080_v62 = vpop.f32.mrb[29].mxu1 }
 0x1fc   : > { %1169 = vst [vmem:[%s1939_s19 + $0x30] sm:$0xff] %v1161_v61  ;;  %vm1127_vm2 = vcmp.gt.f32.partialorder %v1080_v62, 0.0 }
 0x1fd   : > { %vm1152_vm5 = vmpackc.low %vm1128_vm3, %vm1127_vm2 }
 0x1fe   : > { %v1574_v63 = vpop.f32.mrb[30].mxu1 }
 0x1ff   : > { %vm1130_vm6 = vcmp.gt.f32.partialorder %v1574_v63, 0.0  ;;  %v1090_v0 = vpop.f32.mrb[31].mxu1 }
 0x200   : > { %vm1129_vm4 = vcmp.gt.f32.partialorder %v1090_v0, 0.0 }
 0x201   : > { %vm1153_vm7 = vmpackc.low %vm1130_vm6, %vm1129_vm4 }
 0x202   : > { %vm1154_vm8 = vmpackc.even %vm1153_vm7, %vm1152_vm5 }
 0x203   : > { %v1162_v1 = vsel %vm1154_vm8, 16843009, %v1735_v28 }
 0x204   : > { %1170 = vst [vmem:[%s1939_s19 + $0x38] sm:$0xff] %v1162_v1 }
 0x205   : > { %1668 = shalt.err (!%p1665_p5)
}
 0x206   : > { %s1669_s6 = scalar_lea.hbm %s1971_s28, 1024  ;;  %s1673_s9 = scalar_lea.hbm %s2028_s3, 2048 }
 0x207   : > { %p1670_p6 = scmp.ne.s32.totalorder %s1971_s28, %s1669_s6  ;;  %p1674_p10 = scmp.lt.u32.totalorder %s1971_s28, %s2028_s3 }
 0x208   : > { %p1675_p11 = scmp.lt.u32.totalorder %s1673_s9, %s1669_s6  ;;  %p1677_p13 = scmp.lt.u32.totalorder %s1669_s6, %s1971_s28 }
 0x209   : > { %p1671_p7 = pnand %p1670_p6, %p1799_p4 }
 0x20a   : > { %p1676_p12 = por %p1675_p11, %p1674_p10 }
 0x20b   : > { %p1672_p9 = pneg %p1671_p7 }
 0x20c   : > { %p1678_p0 = por %p1677_p13, %p1676_p12 }
 0x20e   : > { %p1679_p1 = pnand %p1678_p0, %p1672_p9 }
 0x210   : > { %1682 = shalt.err (!%p1679_p1)
}
 0x211   : > { %s1737_s18 = smov 128   ;;  %s1738_s19 = smov 8  }
 0x212   : > { %1597 = dma.vmem_to_hbm [thread:$0]  (%p1799_p4), %s1973_s23, 1024, %s1971_s28, %s1979_s15, %s1737_s18, %s1737_s18, %s1738_s19  }
 0x213 PF: > { %p1603_p2 = scmp.ge.s32.totalorder %s1733_s17, 2  ;;  %s1203_s21 = sand.u32 1, %s1713_s12  }
 0x214   : > { %s1204_s26 = scalar_lea.sflag [#allocation4], %s1203_s21 }
 0x215   : > { %p1600_p3 = pnand %p1603_p2, %p1806_p8 }
 0x217   : > { %1708 = dma.done.wait (!%p1600_p3), %s1204_s26, 1024  }
 0x218   : > { %1710 = vsyncadd (!%p1600_p3), %s1204_s26, 4294966272  ;;  %s16_s17 = sadd.s32 1, %s1733_s17   ;;  %s2035_s12 = smov %s1717_s13 }
 0x219   : > { %p13_p5 = scmp.ge.s32.totalorder %s16_s17, 4   ;;  %s2036_s13 = smov %s1721_s14 }
 0x21a   : > { %s2037_s14 = smov %s1812_s25  ;;  %s2038_s15 = smov %s1729_s16 }
 0x21b   : > { %s2039_s16 = smov %s2041_s20  ;;  %15 = sbr.rel (!%p13_p5) target bundleno = 4 (0x4), region = 79 }
 0x222   :  { %1209 = vsyncpa [#allocation4], 1 }
 0x223   :  { %1211 = vsyncpa [#allocation4 + $0x1], 1 }

</bundles_post_ra>
